<compile_context>
chip_gen: v7x
topology: tpu7x:2x2x1
jax: 0.10.0
libtpu: 0.0.40
codegen_flags: <defaults>
</compile_context>

<pallas_src>
import jax
import jax.numpy as jnp
from jax.experimental import pallas as pl
from jax.experimental.pallas import tpu as pltpu


def _make_conv_kernel(H, W, Cin, Cout):
    P = H * W

    def kernel(x_ref, w_ref, m_ref, b_ref, o_ref):
        # x_ref: (1, Cin, P)   raw input, lane-dense flattened spatial (one image)
        # w_ref: (Cout, 27)    conv weights, column k = (kh*3 + kw)*Cin + ci
        # m_ref: (9, P)        0/1 tap-validity masks, t = (dh+1)*3 + (dw+1)
        # b_ref: (Cout, 1)     bias with "+ value" pre-folded
        # o_ref: (1, Cout, P)  output block, lane-dense spatial
        x = x_ref[0].astype(jnp.float32)                     # (Cin, P)
        acc = jnp.zeros((Cout, P), jnp.float32)
        t = 0
        for dh in (-1, 0, 1):
            for dw in (-1, 0, 1):
                s = dh * W + dw                              # flat-index shift of this tap
                # tap[q] = x[q + s] where in-bounds, else 0 (mask also kills roll wrap).
                xs = x if s == 0 else pltpu.roll(x, shift=(-s) % P, axis=1)
                tap = xs * m_ref[pl.ds(t, 1), :]             # (Cin, P)
                for ci in range(Cin):
                    k = t * Cin + ci
                    # (Cout, 1) * (1, P) broadcast-FMA on the VPU (exact f32).
                    acc = acc + w_ref[:, pl.ds(k, 1)] * tap[ci:ci + 1, :]
                t += 1
        o_ref[0] = jnp.maximum(acc + b_ref[...], 0.0).astype(o_ref.dtype)

    return kernel


def model_forward(x_nchw, weight_oihw, bias, value, *, use_bf16=False):
    """Equivalent of Model.forward: relu(conv2d(x) + value).  NCHW in / NCHW out."""
    N, Cin, H, W = x_nchw.shape
    Cout, Cin_w, KH, KW = weight_oihw.shape
    assert (Cin_w, KH, KW) == (Cin, 3, 3), "kernel specialized to 3x3, stride=1, pad=1"
    P = H * W
    K = KH * KW * Cin                                        # 27

    # Lane-dense channel-major input: merging the two minor dims is a free reshape
    # (no transpose, no im2col materialization in HBM).
    in_dtype = jnp.bfloat16 if use_bf16 else jnp.float32
    x_flat = x_nchw.reshape(N, Cin, P).astype(in_dtype)

    # Weight columns ordered to match the kernel's tap loop: k = (kh*3 + kw)*Cin + ci.
    w2 = jnp.transpose(weight_oihw, (0, 2, 3, 1)).reshape(Cout, K).astype(jnp.float32)
    # Fold "+ value" into the conv bias.
    b2 = (bias.astype(jnp.float32) + jnp.asarray(value, jnp.float32)).reshape(Cout, 1)

    # Per-tap boundary masks (replaces the HBM-materialized im2col columns):
    # mask[t, h*W + w] = 1 iff (h+dh, w+dw) is inside the image.
    hh = jnp.arange(H, dtype=jnp.int32).reshape(H, 1)
    ww = jnp.arange(W, dtype=jnp.int32).reshape(1, W)
    rows = []
    for dh in (-1, 0, 1):
        for dw in (-1, 0, 1):
            ok = (hh + dh >= 0) & (hh + dh < H) & (ww + dw >= 0) & (ww + dw < W)
            rows.append(ok.reshape(P))
    masks = jnp.stack(rows, axis=0).astype(jnp.float32)      # (9, P)

    # VMEM budget: double-buffered input/output blocks + once-fetched constants.
    # Budgeted against v7x's smaller VMEM; v5e/v6e have more headroom.
    itemsize_in = 2 if use_bf16 else 4
    per_step_bytes = (2 * (Cin * P * itemsize_in + Cout * P * 4)
                      + (9 * P + Cout * K + Cout) * 4)
    assert per_step_bytes <= 24 * 1024 * 1024, "per-image working set too large"
    # TODO(synk): halo-based row tiling for very large images (whole-image blocks here).

    kernel = _make_conv_kernel(H, W, Cin, Cout)

    out = pl.pallas_call(
        kernel,
        out_shape=jax.ShapeDtypeStruct((N, Cout, P), jnp.float32),
        grid=(N,),
        in_specs=[
            pl.BlockSpec((1, Cin, P), lambda n: (n, 0, 0)),   # streamed per image
            pl.BlockSpec((Cout, K), lambda n: (0, 0)),        # constant block
            pl.BlockSpec((9, P), lambda n: (0, 0)),           # constant block
            pl.BlockSpec((Cout, 1), lambda n: (0, 0)),        # constant block
        ],
        out_specs=pl.BlockSpec((1, Cout, P), lambda n: (n, 0, 0)),
        compiler_params=pltpu.CompilerParams(
            dimension_semantics=("parallel",),                 # batch shards across v7x's 2 TCs
            vmem_limit_bytes=32 * 1024 * 1024,
        ),
    )(x_flat, w2, masks, b2)

    return out.reshape(N, Cout, H, W)                          # already channel-major (NCHW)


def reference_forward(x_nchw, weight_oihw, bias, value):
    y = jax.lax.conv_general_dilated(
        x_nchw, weight_oihw,
        window_strides=(1, 1),
        padding=((1, 1), (1, 1)),
        dimension_numbers=("NCHW", "OIHW", "NCHW"),
        precision=jax.lax.Precision.HIGHEST,
    )
    y = y + bias.reshape(1, -1, 1, 1) + value
    return jnp.maximum(y, 0.0)


if __name__ == "__main__":
    key = jax.random.PRNGKey(0)
    kx, kw, kb = jax.random.split(key, 3)

    # Small shapes consistent with Conv2d(3, 8, 3, stride=1, padding=1).
    N, Cin, H, W, Cout = 2, 3, 16, 16, 8
    value = 1.0

    x = jax.random.normal(kx, (N, Cin, H, W), dtype=jnp.float32)
    weight = jax.random.normal(kw, (Cout, Cin, 3, 3), dtype=jnp.float32) * 0.1
    bias = jax.random.normal(kb, (Cout,), dtype=jnp.float32) * 0.1

    out = model_forward(x, weight, bias, value)
    out = jax.block_until_ready(out)

    ref = reference_forward(x, weight, bias, value)
    assert out.shape == (N, Cout, H, W), out.shape
    assert jnp.allclose(out, ref, atol=1e-4, rtol=1e-4), "mismatch vs reference conv"

    print("KERNEL_OK")
</pallas_src>

<mosaic_0001>
module attributes {stable_mosaic.version = 11 : i64} {
  func.func @kernel(%arg0: i32, %arg1: memref<1x3x256xf32, #tpu.memory_space<vmem>>, %arg2: memref<8x27xf32, #tpu.memory_space<vmem>>, %arg3: memref<9x256xf32, #tpu.memory_space<vmem>>, %arg4: memref<8x1xf32, #tpu.memory_space<vmem>>, %arg5: memref<1x8x256xf32, #tpu.memory_space<vmem>>) attributes {dimension_semantics = [#tpu.dimension_semantics<parallel>], iteration_bounds = array<i64: 2>, scalar_prefetch = 0 : i64, scratch_operands = 0 : i64, tpu.core_type = #tpu.core_type<tc>, window_params = [{transform_indices = @transform_0, window_bounds = array<i64: 1, 3, 256>}, {pipeline_mode = #tpu.pipeline_mode<synchronous>, transform_indices = @transform_1, window_bounds = array<i64: 8, 27>}, {pipeline_mode = #tpu.pipeline_mode<synchronous>, transform_indices = @transform_2, window_bounds = array<i64: 9, 256>}, {pipeline_mode = #tpu.pipeline_mode<synchronous>, transform_indices = @transform_3, window_bounds = array<i64: 8, 1>}, {transform_indices = @transform_4, window_bounds = array<i64: 1, 8, 256>}]} {
    %c0 = arith.constant 0 : index
    %c0_0 = arith.constant 0 : index
    %c0_1 = arith.constant 0 : index
    %0 = vector.load %arg1[%c0, %c0_0, %c0_1] : memref<1x3x256xf32, #tpu.memory_space<vmem>>, vector<1x3x256xf32>
    %1 = vector.shape_cast %0 : vector<1x3x256xf32> to vector<3x256xf32>
    %cst = arith.constant 0.000000e+00 : f32
    %2 = vector.broadcast %cst : f32 to vector<8x256xf32>
    %c17_i32 = arith.constant 17 : i32
    %3 = tpu.dynamic_rotate %1 by %c17_i32 dim 1 : vector<3x256xf32>, i32 -> vector<3x256xf32>
    %c0_2 = arith.constant 0 : index
    %c0_3 = arith.constant 0 : index
    %4 = vector.load %arg3[%c0_2, %c0_3] : memref<9x256xf32, #tpu.memory_space<vmem>>, vector<1x256xf32>
    %5 = vector.broadcast %4 : vector<1x256xf32> to vector<3x256xf32>
    %6 = arith.mulf %3, %5 : vector<3x256xf32>
    %c0_4 = arith.constant 0 : index
    %c0_5 = arith.constant 0 : index
    %7 = vector.load %arg2[%c0_4, %c0_5] : memref<8x27xf32, #tpu.memory_space<vmem>>, vector<8x1xf32>
    %8 = vector.extract_strided_slice %6 {offsets = [0, 0], sizes = [1, 256], strides = [1, 1]} : vector<3x256xf32> to vector<1x256xf32>
    %9 = vector.broadcast %7 : vector<8x1xf32> to vector<8x256xf32>
    %10 = vector.broadcast %8 : vector<1x256xf32> to vector<8x256xf32>
    %11 = arith.mulf %9, %10 : vector<8x256xf32>
    %12 = arith.addf %2, %11 : vector<8x256xf32>
    %c0_6 = arith.constant 0 : index
    %c1 = arith.constant 1 : index
    %13 = vector.load %arg2[%c0_6, %c1] : memref<8x27xf32, #tpu.memory_space<vmem>>, vector<8x1xf32>
    %14 = vector.extract_strided_slice %6 {offsets = [1, 0], sizes = [1, 256], strides = [1, 1]} : vector<3x256xf32> to vector<1x256xf32>
    %15 = vector.broadcast %13 : vector<8x1xf32> to vector<8x256xf32>
    %16 = vector.broadcast %14 : vector<1x256xf32> to vector<8x256xf32>
    %17 = arith.mulf %15, %16 : vector<8x256xf32>
    %18 = arith.addf %12, %17 : vector<8x256xf32>
    %c0_7 = arith.constant 0 : index
    %c2 = arith.constant 2 : index
    %19 = vector.load %arg2[%c0_7, %c2] : memref<8x27xf32, #tpu.memory_space<vmem>>, vector<8x1xf32>
    %20 = vector.extract_strided_slice %6 {offsets = [2, 0], sizes = [1, 256], strides = [1, 1]} : vector<3x256xf32> to vector<1x256xf32>
    %21 = vector.broadcast %19 : vector<8x1xf32> to vector<8x256xf32>
    %22 = vector.broadcast %20 : vector<1x256xf32> to vector<8x256xf32>
    %23 = arith.mulf %21, %22 : vector<8x256xf32>
    %24 = arith.addf %18, %23 : vector<8x256xf32>
    %c16_i32 = arith.constant 16 : i32
    %25 = tpu.dynamic_rotate %1 by %c16_i32 dim 1 : vector<3x256xf32>, i32 -> vector<3x256xf32>
    %c1_8 = arith.constant 1 : index
    %c0_9 = arith.constant 0 : index
    %26 = vector.load %arg3[%c1_8, %c0_9] : memref<9x256xf32, #tpu.memory_space<vmem>>, vector<1x256xf32>
    %27 = vector.broadcast %26 : vector<1x256xf32> to vector<3x256xf32>
    %28 = arith.mulf %25, %27 : vector<3x256xf32>
    %c0_10 = arith.constant 0 : index
    %c3 = arith.constant 3 : index
    %29 = vector.load %arg2[%c0_10, %c3] : memref<8x27xf32, #tpu.memory_space<vmem>>, vector<8x1xf32>
    %30 = vector.extract_strided_slice %28 {offsets = [0, 0], sizes = [1, 256], strides = [1, 1]} : vector<3x256xf32> to vector<1x256xf32>
    %31 = vector.broadcast %29 : vector<8x1xf32> to vector<8x256xf32>
    %32 = vector.broadcast %30 : vector<1x256xf32> to vector<8x256xf32>
    %33 = arith.mulf %31, %32 : vector<8x256xf32>
    %34 = arith.addf %24, %33 : vector<8x256xf32>
    %c0_11 = arith.constant 0 : index
    %c4 = arith.constant 4 : index
    %35 = vector.load %arg2[%c0_11, %c4] : memref<8x27xf32, #tpu.memory_space<vmem>>, vector<8x1xf32>
    %36 = vector.extract_strided_slice %28 {offsets = [1, 0], sizes = [1, 256], strides = [1, 1]} : vector<3x256xf32> to vector<1x256xf32>
    %37 = vector.broadcast %35 : vector<8x1xf32> to vector<8x256xf32>
    %38 = vector.broadcast %36 : vector<1x256xf32> to vector<8x256xf32>
    %39 = arith.mulf %37, %38 : vector<8x256xf32>
    %40 = arith.addf %34, %39 : vector<8x256xf32>
    %c0_12 = arith.constant 0 : index
    %c5 = arith.constant 5 : index
    %41 = vector.load %arg2[%c0_12, %c5] : memref<8x27xf32, #tpu.memory_space<vmem>>, vector<8x1xf32>
    %42 = vector.extract_strided_slice %28 {offsets = [2, 0], sizes = [1, 256], strides = [1, 1]} : vector<3x256xf32> to vector<1x256xf32>
    %43 = vector.broadcast %41 : vector<8x1xf32> to vector<8x256xf32>
    %44 = vector.broadcast %42 : vector<1x256xf32> to vector<8x256xf32>
    %45 = arith.mulf %43, %44 : vector<8x256xf32>
    %46 = arith.addf %40, %45 : vector<8x256xf32>
    %c15_i32 = arith.constant 15 : i32
    %47 = tpu.dynamic_rotate %1 by %c15_i32 dim 1 : vector<3x256xf32>, i32 -> vector<3x256xf32>
    %c2_13 = arith.constant 2 : index
    %c0_14 = arith.constant 0 : index
    %48 = vector.load %arg3[%c2_13, %c0_14] : memref<9x256xf32, #tpu.memory_space<vmem>>, vector<1x256xf32>
    %49 = vector.broadcast %48 : vector<1x256xf32> to vector<3x256xf32>
    %50 = arith.mulf %47, %49 : vector<3x256xf32>
    %c0_15 = arith.constant 0 : index
    %c6 = arith.constant 6 : index
    %51 = vector.load %arg2[%c0_15, %c6] : memref<8x27xf32, #tpu.memory_space<vmem>>, vector<8x1xf32>
    %52 = vector.extract_strided_slice %50 {offsets = [0, 0], sizes = [1, 256], strides = [1, 1]} : vector<3x256xf32> to vector<1x256xf32>
    %53 = vector.broadcast %51 : vector<8x1xf32> to vector<8x256xf32>
    %54 = vector.broadcast %52 : vector<1x256xf32> to vector<8x256xf32>
    %55 = arith.mulf %53, %54 : vector<8x256xf32>
    %56 = arith.addf %46, %55 : vector<8x256xf32>
    %c0_16 = arith.constant 0 : index
    %c7 = arith.constant 7 : index
    %57 = vector.load %arg2[%c0_16, %c7] : memref<8x27xf32, #tpu.memory_space<vmem>>, vector<8x1xf32>
    %58 = vector.extract_strided_slice %50 {offsets = [1, 0], sizes = [1, 256], strides = [1, 1]} : vector<3x256xf32> to vector<1x256xf32>
    %59 = vector.broadcast %57 : vector<8x1xf32> to vector<8x256xf32>
    %60 = vector.broadcast %58 : vector<1x256xf32> to vector<8x256xf32>
    %61 = arith.mulf %59, %60 : vector<8x256xf32>
    %62 = arith.addf %56, %61 : vector<8x256xf32>
    %c0_17 = arith.constant 0 : index
    %c8 = arith.constant 8 : index
    %63 = vector.load %arg2[%c0_17, %c8] : memref<8x27xf32, #tpu.memory_space<vmem>>, vector<8x1xf32>
    %64 = vector.extract_strided_slice %50 {offsets = [2, 0], sizes = [1, 256], strides = [1, 1]} : vector<3x256xf32> to vector<1x256xf32>
    %65 = vector.broadcast %63 : vector<8x1xf32> to vector<8x256xf32>
    %66 = vector.broadcast %64 : vector<1x256xf32> to vector<8x256xf32>
    %67 = arith.mulf %65, %66 : vector<8x256xf32>
    %68 = arith.addf %62, %67 : vector<8x256xf32>
    %c1_i32 = arith.constant 1 : i32
    %69 = tpu.dynamic_rotate %1 by %c1_i32 dim 1 : vector<3x256xf32>, i32 -> vector<3x256xf32>
    %c3_18 = arith.constant 3 : index
    %c0_19 = arith.constant 0 : index
    %70 = vector.load %arg3[%c3_18, %c0_19] : memref<9x256xf32, #tpu.memory_space<vmem>>, vector<1x256xf32>
    %71 = vector.broadcast %70 : vector<1x256xf32> to vector<3x256xf32>
    %72 = arith.mulf %69, %71 : vector<3x256xf32>
    %c0_20 = arith.constant 0 : index
    %c9 = arith.constant 9 : index
    %73 = vector.load %arg2[%c0_20, %c9] : memref<8x27xf32, #tpu.memory_space<vmem>>, vector<8x1xf32>
    %74 = vector.extract_strided_slice %72 {offsets = [0, 0], sizes = [1, 256], strides = [1, 1]} : vector<3x256xf32> to vector<1x256xf32>
    %75 = vector.broadcast %73 : vector<8x1xf32> to vector<8x256xf32>
    %76 = vector.broadcast %74 : vector<1x256xf32> to vector<8x256xf32>
    %77 = arith.mulf %75, %76 : vector<8x256xf32>
    %78 = arith.addf %68, %77 : vector<8x256xf32>
    %c0_21 = arith.constant 0 : index
    %c10 = arith.constant 10 : index
    %79 = vector.load %arg2[%c0_21, %c10] : memref<8x27xf32, #tpu.memory_space<vmem>>, vector<8x1xf32>
    %80 = vector.extract_strided_slice %72 {offsets = [1, 0], sizes = [1, 256], strides = [1, 1]} : vector<3x256xf32> to vector<1x256xf32>
    %81 = vector.broadcast %79 : vector<8x1xf32> to vector<8x256xf32>
    %82 = vector.broadcast %80 : vector<1x256xf32> to vector<8x256xf32>
    %83 = arith.mulf %81, %82 : vector<8x256xf32>
    %84 = arith.addf %78, %83 : vector<8x256xf32>
    %c0_22 = arith.constant 0 : index
    %c11 = arith.constant 11 : index
    %85 = vector.load %arg2[%c0_22, %c11] : memref<8x27xf32, #tpu.memory_space<vmem>>, vector<8x1xf32>
    %86 = vector.extract_strided_slice %72 {offsets = [2, 0], sizes = [1, 256], strides = [1, 1]} : vector<3x256xf32> to vector<1x256xf32>
    %87 = vector.broadcast %85 : vector<8x1xf32> to vector<8x256xf32>
    %88 = vector.broadcast %86 : vector<1x256xf32> to vector<8x256xf32>
    %89 = arith.mulf %87, %88 : vector<8x256xf32>
    %90 = arith.addf %84, %89 : vector<8x256xf32>
    %c4_23 = arith.constant 4 : index
    %c0_24 = arith.constant 0 : index
    %91 = vector.load %arg3[%c4_23, %c0_24] : memref<9x256xf32, #tpu.memory_space<vmem>>, vector<1x256xf32>
    %92 = vector.broadcast %91 : vector<1x256xf32> to vector<3x256xf32>
    %93 = arith.mulf %1, %92 : vector<3x256xf32>
    %c0_25 = arith.constant 0 : index
    %c12 = arith.constant 12 : index
    %94 = vector.load %arg2[%c0_25, %c12] : memref<8x27xf32, #tpu.memory_space<vmem>>, vector<8x1xf32>
    %95 = vector.extract_strided_slice %93 {offsets = [0, 0], sizes = [1, 256], strides = [1, 1]} : vector<3x256xf32> to vector<1x256xf32>
    %96 = vector.broadcast %94 : vector<8x1xf32> to vector<8x256xf32>
    %97 = vector.broadcast %95 : vector<1x256xf32> to vector<8x256xf32>
    %98 = arith.mulf %96, %97 : vector<8x256xf32>
    %99 = arith.addf %90, %98 : vector<8x256xf32>
    %c0_26 = arith.constant 0 : index
    %c13 = arith.constant 13 : index
    %100 = vector.load %arg2[%c0_26, %c13] : memref<8x27xf32, #tpu.memory_space<vmem>>, vector<8x1xf32>
    %101 = vector.extract_strided_slice %93 {offsets = [1, 0], sizes = [1, 256], strides = [1, 1]} : vector<3x256xf32> to vector<1x256xf32>
    %102 = vector.broadcast %100 : vector<8x1xf32> to vector<8x256xf32>
    %103 = vector.broadcast %101 : vector<1x256xf32> to vector<8x256xf32>
    %104 = arith.mulf %102, %103 : vector<8x256xf32>
    %105 = arith.addf %99, %104 : vector<8x256xf32>
    %c0_27 = arith.constant 0 : index
    %c14 = arith.constant 14 : index
    %106 = vector.load %arg2[%c0_27, %c14] : memref<8x27xf32, #tpu.memory_space<vmem>>, vector<8x1xf32>
    %107 = vector.extract_strided_slice %93 {offsets = [2, 0], sizes = [1, 256], strides = [1, 1]} : vector<3x256xf32> to vector<1x256xf32>
    %108 = vector.broadcast %106 : vector<8x1xf32> to vector<8x256xf32>
    %109 = vector.broadcast %107 : vector<1x256xf32> to vector<8x256xf32>
    %110 = arith.mulf %108, %109 : vector<8x256xf32>
    %111 = arith.addf %105, %110 : vector<8x256xf32>
    %c255_i32 = arith.constant 255 : i32
    %112 = tpu.dynamic_rotate %1 by %c255_i32 dim 1 : vector<3x256xf32>, i32 -> vector<3x256xf32>
    %c5_28 = arith.constant 5 : index
    %c0_29 = arith.constant 0 : index
    %113 = vector.load %arg3[%c5_28, %c0_29] : memref<9x256xf32, #tpu.memory_space<vmem>>, vector<1x256xf32>
    %114 = vector.broadcast %113 : vector<1x256xf32> to vector<3x256xf32>
    %115 = arith.mulf %112, %114 : vector<3x256xf32>
    %c0_30 = arith.constant 0 : index
    %c15 = arith.constant 15 : index
    %116 = vector.load %arg2[%c0_30, %c15] : memref<8x27xf32, #tpu.memory_space<vmem>>, vector<8x1xf32>
    %117 = vector.extract_strided_slice %115 {offsets = [0, 0], sizes = [1, 256], strides = [1, 1]} : vector<3x256xf32> to vector<1x256xf32>
    %118 = vector.broadcast %116 : vector<8x1xf32> to vector<8x256xf32>
    %119 = vector.broadcast %117 : vector<1x256xf32> to vector<8x256xf32>
    %120 = arith.mulf %118, %119 : vector<8x256xf32>
    %121 = arith.addf %111, %120 : vector<8x256xf32>
    %c0_31 = arith.constant 0 : index
    %c16 = arith.constant 16 : index
    %122 = vector.load %arg2[%c0_31, %c16] : memref<8x27xf32, #tpu.memory_space<vmem>>, vector<8x1xf32>
    %123 = vector.extract_strided_slice %115 {offsets = [1, 0], sizes = [1, 256], strides = [1, 1]} : vector<3x256xf32> to vector<1x256xf32>
    %124 = vector.broadcast %122 : vector<8x1xf32> to vector<8x256xf32>
    %125 = vector.broadcast %123 : vector<1x256xf32> to vector<8x256xf32>
    %126 = arith.mulf %124, %125 : vector<8x256xf32>
    %127 = arith.addf %121, %126 : vector<8x256xf32>
    %c0_32 = arith.constant 0 : index
    %c17 = arith.constant 17 : index
    %128 = vector.load %arg2[%c0_32, %c17] : memref<8x27xf32, #tpu.memory_space<vmem>>, vector<8x1xf32>
    %129 = vector.extract_strided_slice %115 {offsets = [2, 0], sizes = [1, 256], strides = [1, 1]} : vector<3x256xf32> to vector<1x256xf32>
    %130 = vector.broadcast %128 : vector<8x1xf32> to vector<8x256xf32>
    %131 = vector.broadcast %129 : vector<1x256xf32> to vector<8x256xf32>
    %132 = arith.mulf %130, %131 : vector<8x256xf32>
    %133 = arith.addf %127, %132 : vector<8x256xf32>
    %c241_i32 = arith.constant 241 : i32
    %134 = tpu.dynamic_rotate %1 by %c241_i32 dim 1 : vector<3x256xf32>, i32 -> vector<3x256xf32>
    %c6_33 = arith.constant 6 : index
    %c0_34 = arith.constant 0 : index
    %135 = vector.load %arg3[%c6_33, %c0_34] : memref<9x256xf32, #tpu.memory_space<vmem>>, vector<1x256xf32>
    %136 = vector.broadcast %135 : vector<1x256xf32> to vector<3x256xf32>
    %137 = arith.mulf %134, %136 : vector<3x256xf32>
    %c0_35 = arith.constant 0 : index
    %c18 = arith.constant 18 : index
    %138 = vector.load %arg2[%c0_35, %c18] : memref<8x27xf32, #tpu.memory_space<vmem>>, vector<8x1xf32>
    %139 = vector.extract_strided_slice %137 {offsets = [0, 0], sizes = [1, 256], strides = [1, 1]} : vector<3x256xf32> to vector<1x256xf32>
    %140 = vector.broadcast %138 : vector<8x1xf32> to vector<8x256xf32>
    %141 = vector.broadcast %139 : vector<1x256xf32> to vector<8x256xf32>
    %142 = arith.mulf %140, %141 : vector<8x256xf32>
    %143 = arith.addf %133, %142 : vector<8x256xf32>
    %c0_36 = arith.constant 0 : index
    %c19 = arith.constant 19 : index
    %144 = vector.load %arg2[%c0_36, %c19] : memref<8x27xf32, #tpu.memory_space<vmem>>, vector<8x1xf32>
    %145 = vector.extract_strided_slice %137 {offsets = [1, 0], sizes = [1, 256], strides = [1, 1]} : vector<3x256xf32> to vector<1x256xf32>
    %146 = vector.broadcast %144 : vector<8x1xf32> to vector<8x256xf32>
    %147 = vector.broadcast %145 : vector<1x256xf32> to vector<8x256xf32>
    %148 = arith.mulf %146, %147 : vector<8x256xf32>
    %149 = arith.addf %143, %148 : vector<8x256xf32>
    %c0_37 = arith.constant 0 : index
    %c20 = arith.constant 20 : index
    %150 = vector.load %arg2[%c0_37, %c20] : memref<8x27xf32, #tpu.memory_space<vmem>>, vector<8x1xf32>
    %151 = vector.extract_strided_slice %137 {offsets = [2, 0], sizes = [1, 256], strides = [1, 1]} : vector<3x256xf32> to vector<1x256xf32>
    %152 = vector.broadcast %150 : vector<8x1xf32> to vector<8x256xf32>
    %153 = vector.broadcast %151 : vector<1x256xf32> to vector<8x256xf32>
    %154 = arith.mulf %152, %153 : vector<8x256xf32>
    %155 = arith.addf %149, %154 : vector<8x256xf32>
    %c240_i32 = arith.constant 240 : i32
    %156 = tpu.dynamic_rotate %1 by %c240_i32 dim 1 : vector<3x256xf32>, i32 -> vector<3x256xf32>
    %c7_38 = arith.constant 7 : index
    %c0_39 = arith.constant 0 : index
    %157 = vector.load %arg3[%c7_38, %c0_39] : memref<9x256xf32, #tpu.memory_space<vmem>>, vector<1x256xf32>
    %158 = vector.broadcast %157 : vector<1x256xf32> to vector<3x256xf32>
    %159 = arith.mulf %156, %158 : vector<3x256xf32>
    %c0_40 = arith.constant 0 : index
    %c21 = arith.constant 21 : index
    %160 = vector.load %arg2[%c0_40, %c21] : memref<8x27xf32, #tpu.memory_space<vmem>>, vector<8x1xf32>
    %161 = vector.extract_strided_slice %159 {offsets = [0, 0], sizes = [1, 256], strides = [1, 1]} : vector<3x256xf32> to vector<1x256xf32>
    %162 = vector.broadcast %160 : vector<8x1xf32> to vector<8x256xf32>
    %163 = vector.broadcast %161 : vector<1x256xf32> to vector<8x256xf32>
    %164 = arith.mulf %162, %163 : vector<8x256xf32>
    %165 = arith.addf %155, %164 : vector<8x256xf32>
    %c0_41 = arith.constant 0 : index
    %c22 = arith.constant 22 : index
    %166 = vector.load %arg2[%c0_41, %c22] : memref<8x27xf32, #tpu.memory_space<vmem>>, vector<8x1xf32>
    %167 = vector.extract_strided_slice %159 {offsets = [1, 0], sizes = [1, 256], strides = [1, 1]} : vector<3x256xf32> to vector<1x256xf32>
    %168 = vector.broadcast %166 : vector<8x1xf32> to vector<8x256xf32>
    %169 = vector.broadcast %167 : vector<1x256xf32> to vector<8x256xf32>
    %170 = arith.mulf %168, %169 : vector<8x256xf32>
    %171 = arith.addf %165, %170 : vector<8x256xf32>
    %c0_42 = arith.constant 0 : index
    %c23 = arith.constant 23 : index
    %172 = vector.load %arg2[%c0_42, %c23] : memref<8x27xf32, #tpu.memory_space<vmem>>, vector<8x1xf32>
    %173 = vector.extract_strided_slice %159 {offsets = [2, 0], sizes = [1, 256], strides = [1, 1]} : vector<3x256xf32> to vector<1x256xf32>
    %174 = vector.broadcast %172 : vector<8x1xf32> to vector<8x256xf32>
    %175 = vector.broadcast %173 : vector<1x256xf32> to vector<8x256xf32>
    %176 = arith.mulf %174, %175 : vector<8x256xf32>
    %177 = arith.addf %171, %176 : vector<8x256xf32>
    %c239_i32 = arith.constant 239 : i32
    %178 = tpu.dynamic_rotate %1 by %c239_i32 dim 1 : vector<3x256xf32>, i32 -> vector<3x256xf32>
    %c8_43 = arith.constant 8 : index
    %c0_44 = arith.constant 0 : index
    %179 = vector.load %arg3[%c8_43, %c0_44] : memref<9x256xf32, #tpu.memory_space<vmem>>, vector<1x256xf32>
    %180 = vector.broadcast %179 : vector<1x256xf32> to vector<3x256xf32>
    %181 = arith.mulf %178, %180 : vector<3x256xf32>
    %c0_45 = arith.constant 0 : index
    %c24 = arith.constant 24 : index
    %182 = vector.load %arg2[%c0_45, %c24] : memref<8x27xf32, #tpu.memory_space<vmem>>, vector<8x1xf32>
    %183 = vector.extract_strided_slice %181 {offsets = [0, 0], sizes = [1, 256], strides = [1, 1]} : vector<3x256xf32> to vector<1x256xf32>
    %184 = vector.broadcast %182 : vector<8x1xf32> to vector<8x256xf32>
    %185 = vector.broadcast %183 : vector<1x256xf32> to vector<8x256xf32>
    %186 = arith.mulf %184, %185 : vector<8x256xf32>
    %187 = arith.addf %177, %186 : vector<8x256xf32>
    %c0_46 = arith.constant 0 : index
    %c25 = arith.constant 25 : index
    %188 = vector.load %arg2[%c0_46, %c25] : memref<8x27xf32, #tpu.memory_space<vmem>>, vector<8x1xf32>
    %189 = vector.extract_strided_slice %181 {offsets = [1, 0], sizes = [1, 256], strides = [1, 1]} : vector<3x256xf32> to vector<1x256xf32>
    %190 = vector.broadcast %188 : vector<8x1xf32> to vector<8x256xf32>
    %191 = vector.broadcast %189 : vector<1x256xf32> to vector<8x256xf32>
    %192 = arith.mulf %190, %191 : vector<8x256xf32>
    %193 = arith.addf %187, %192 : vector<8x256xf32>
    %c0_47 = arith.constant 0 : index
    %c26 = arith.constant 26 : index
    %194 = vector.load %arg2[%c0_47, %c26] : memref<8x27xf32, #tpu.memory_space<vmem>>, vector<8x1xf32>
    %195 = vector.extract_strided_slice %181 {offsets = [2, 0], sizes = [1, 256], strides = [1, 1]} : vector<3x256xf32> to vector<1x256xf32>
    %196 = vector.broadcast %194 : vector<8x1xf32> to vector<8x256xf32>
    %197 = vector.broadcast %195 : vector<1x256xf32> to vector<8x256xf32>
    %198 = arith.mulf %196, %197 : vector<8x256xf32>
    %199 = arith.addf %193, %198 : vector<8x256xf32>
    %c0_48 = arith.constant 0 : index
    %c0_49 = arith.constant 0 : index
    %200 = vector.load %arg4[%c0_48, %c0_49] : memref<8x1xf32, #tpu.memory_space<vmem>>, vector<8x1xf32>
    %201 = vector.broadcast %200 : vector<8x1xf32> to vector<8x256xf32>
    %202 = arith.addf %199, %201 : vector<8x256xf32>
    %cst_50 = arith.constant 0.000000e+00 : f32
    %203 = vector.broadcast %cst_50 : f32 to vector<8x256xf32>
    %204 = arith.maximumf %202, %203 : vector<8x256xf32>
    %c0_51 = arith.constant 0 : index
    %c0_52 = arith.constant 0 : index
    %c0_53 = arith.constant 0 : index
    %205 = vector.load %arg5[%c0_51, %c0_52, %c0_53] : memref<1x8x256xf32, #tpu.memory_space<vmem>>, vector<1x8x256xf32>
    %206 = vector.shape_cast %205 : vector<1x8x256xf32> to vector<8x256xf32>
    %207 = vector.shape_cast %204 : vector<8x256xf32> to vector<1x8x256xf32>
    tpu.vector_store %arg5[%c0_51, %c0_52, %c0_53], %207 {strides = array<i32>} : memref<1x8x256xf32, #tpu.memory_space<vmem>>, vector<1x8x256xf32>,
    return
  }
  func.func @transform_0(%arg0: i32) -> (i32, i32, i32) {
    %c0_i32 = arith.constant 0 : i32
    %c0_i32_0 = arith.constant 0 : i32
    %c0_i32_1 = arith.constant 0 : i32
    return %arg0, %c0_i32, %c0_i32_0 : i32, i32, i32
  }
  func.func @transform_1(%arg0: i32) -> (i32, i32) {
    %c0_i32 = arith.constant 0 : i32
    %c0_i32_0 = arith.constant 0 : i32
    %c0_i32_1 = arith.constant 0 : i32
    return %c0_i32, %c0_i32_0 : i32, i32
  }
  func.func @transform_2(%arg0: i32) -> (i32, i32) {
    %c0_i32 = arith.constant 0 : i32
    %c0_i32_0 = arith.constant 0 : i32
    %c0_i32_1 = arith.constant 0 : i32
    return %c0_i32, %c0_i32_0 : i32, i32
  }
  func.func @transform_3(%arg0: i32) -> (i32, i32) {
    %c0_i32 = arith.constant 0 : i32
    %c0_i32_0 = arith.constant 0 : i32
    %c0_i32_1 = arith.constant 0 : i32
    return %c0_i32, %c0_i32_0 : i32, i32
  }
  func.func @transform_4(%arg0: i32) -> (i32, i32, i32) {
    %c0_i32 = arith.constant 0 : i32
    %c0_i32_0 = arith.constant 0 : i32
    %c0_i32_1 = arith.constant 0 : i32
    return %arg0, %c0_i32, %c0_i32_0 : i32, i32, i32
  }
}

</mosaic_0001>

<bundles_post_ra>
// kernel: tpu_custom_call.1
= control target key start
LH: loop header
LB: loop body
LE: loop exit
PB: predicated region body
PF: predicated region fallthrough
CT: control target
= control target key end

     0   :  { %9 = vsyncpa [#allocation3], 0  ;;  %s1500_s0 = inlined_call_operand.vmem [shape: f32[2,3,256], index: 0, kind: input, shape index: {}]   ;;  %s1501_s1 = inlined_call_operand.vmem [shape: f32[8,27], index: 1, kind: input, shape index: {}]   ;;  %s1502_s2 = inlined_call_operand.vmem [shape: f32[9,256], index: 2, kind: input, shape index: {}]   ;;  %s1503_s3 = inlined_call_operand.vmem [shape: f32[8,1], index: 3, kind: input, shape index: {}]   ;;  %s1504_s4 = inlined_call_operand.hbm [shape: f32[2,8,256], index: 4, kind: output, shape index: {}]  }
   0x1   :  { %11 = vsyncpa [#allocation3 + $0x1], 0  ;;  %s1209_s15 = smov 0   ;;  %s1211_s16 = smov 0  }
   0x2   :  { %s1213_s17 = smov 0   ;;  %s1215_s18 = smov 0  }
   0x3 LB: > { %s1230_s19 = sadd.s32 4294967295, %s1146_s18   ;;  %s958_s20 = sadd.s32 4294967294, %s1146_s18   ;;  %s1146_s18 = sphi %s1215_s18, %s1510_s18   ;;  %s1142_s17 = sphi %s1213_s17, %s1509_s17   ;;  %s1138_s16 = sphi %s1211_s16, %s1508_s16   ;;  %s1134_s15 = sphi %s1209_s15, %s1507_s15  }
   0x4   : > { %s1234_s21 = sadd.s32 1, %s1146_s18   ;;  %s113_s22 = sadd.s32 1, %s1142_s17 }
   0x5   : > { %s110_s23 = ssub.s32 %s1146_s18, %s1234_s21  ;;  %p123_p0 = scmp.ne.s32.totalorder %s1142_s17, %s1138_s16 }
   0x6   : > { %p111_p1 = scmp.eq.s32.totalorder %s110_s23, 0  ;;  %p124_p2 = scmp.eq.s32.totalorder %s1230_s19, 1 }
   0x7   : > { %p129_p3 = scmp.ne.s32.totalorder %s1138_s16, %s1134_s15  ;;  %p130_p4 = scmp.eq.s32.totalorder %s958_s20, 1 }
   0x8   : > { %s1245_s24 = scalar_select %p111_p1, %s1142_s17, %s113_s22  }
   0x9   : > { %p1247_p5 = por %p124_p2, %p123_p0  ;;  %p1251_p6 = por %p130_p4, %p129_p3 }
   0xa   : > { %p961_p7 = scmp.ge.s32.totalorder %s1146_s18, 1  ;;  %p165_p8 = scmp.lt.s32.totalorder %s1146_s18, 3 }
   0xc   : > { %p166_p9 = pnand %p961_p7, %p165_p8 }
   0xd   : > { %v1260_v0 = vld [vmem:[%s1501_s1] sm:$0xff] (!%p166_p9)  ;;  %p191_p10 = scmp.lt.s32.totalorder (!%p166_p9), %s1230_s19, 1  ;;  %v1148_v1 = vmov (!%p166_p9), 0   ;;  %v1149_v2 = vmov (!%p166_p9), 2   ;;  %v1150_v3 = vmov (!%p166_p9), 1   ;;  %s1151_s8 = smov (!%p166_p9), 17   ;;  %v204_v33 = vlaneseq (!%p166_p9) }
   0xe   : > { %169 = sbr.rel (%p166_p9) target bundleno = 281 (0x119), region = 36  ;;  %1054 = vset.pattern.permute.xlu1 (!%p166_p9), %v1148_v1  ;;  %1056 = vset.pattern.permute.xlu0 (!%p166_p9), %v1149_v2  ;;  %s1152_s9 = smov (!%p166_p9), 16   ;;  %v1153_v6 = vmov (!%p166_p9), 4   ;;  %v1154_v7 = vmov (!%p166_p9), 3   ;;  %v1155_v8 = vmov (!%p166_p9), 5   ;;  %v1156_v9 = vmov (!%p166_p9), 6  }
   0xf   : > { %226 = vperm.xlu1 (!%p166_p9), %1054, %v1260_v0   ;;  %s1157_s10 = smov (!%p166_p9), 15   ;;  %v1158_v10 = vmov (!%p166_p9), 8   ;;  %v1159_v11 = vmov (!%p166_p9), 7   ;;  %s1160_s11 = smov (!%p166_p9), 1   ;;  %v1161_v12 = vmov (!%p166_p9), 10   ;;  %v1162_v13 = vmov (!%p166_p9), 9  }
  0x10   : > { %v1163_v14 = vmov (!%p166_p9), 13   ;;  %v1164_v15 = vmov (!%p166_p9), 11   ;;  %s1165_s12 = smov (!%p166_p9), 127   ;;  %v1166_v16 = vmov (!%p166_p9), 16   ;;  %v1167_v17 = vmov (!%p166_p9), 12   ;;  %s1168_s13 = smov (!%p166_p9), 113  }
  0x11   : > { %v1169_v18 = vmov (!%p166_p9), 19   ;;  %v1170_v19 = vmov (!%p166_p9), 14   ;;  %v1171_v20 = vmov (!%p166_p9), 15   ;;  %s1172_s14 = smov (!%p166_p9), 112   ;;  %v1173_v21 = vmov (!%p166_p9), 22   ;;  %s1175_s20 = smov (!%p166_p9), 111  }
  0x12   : > { %v1174_v22 = vmov (!%p166_p9), 17   ;;  %v1176_v23 = vmov (!%p166_p9), 25   ;;  %v1177_v24 = vmov (!%p166_p9), 18   ;;  %v1178_v25 = vmov (!%p166_p9), 20   ;;  %v872_v30 = vld [vmem:[%s1503_s3] sm:$0xff] (!%p166_p9)  ;;  %s188_s28 = sand.u32 (!%p166_p9), 1, %s1138_s16  }
  0x13   : > { %1055 = vset.pattern.permute.xlu1 (!%p166_p9), %v1150_v3  ;;  %v1179_v26 = vmov (!%p166_p9), 21   ;;  %v1180_v27 = vmov (!%p166_p9), 23   ;;  %v1181_v28 = vmov (!%p166_p9), 24   ;;  %v1182_v29 = vmov (!%p166_p9), 26  }
  0x14   : > { %242 = vperm.xlu1 (!%p166_p9), %1055, %v1260_v0   ;;  %v1322_v36 = vshrl.u32 (!%p166_p9), %v204_v33, 7  ;;  %v1324_v37 = vand.u32 (!%p166_p9), 127, %v204_v33  ;;  %v209_v41 = vld [vmem:[%s1502_s2] ss:$8 sm:$0x3] (!%p166_p9) }
  0x15   : > { %s192_s29 = scalar_select %p191_p10, %s1230_s19, 1  ;;  %v965_v46 = vld [vmem:[%s1502_s2 + $0x1] ss:$8 sm:$0x3] }
  0x16   : > { %v1327_v39 = vsub.s32 0, %v1322_v36  ;;  %v1330_v40 = vsub.s32 1, %v1322_v36  ;;  %vm206_vm0 = vcmp.lt.s32.totalorder %v1324_v37, 17  ;;  %vm277_vm1 = vcmp.lt.s32.totalorder %v1324_v37, 16 }
  0x17   : > { %s978_s30 = sshll.u32 %s192_s29, 3  ;;  %v1345_v57 = vsub.s32 2, %v1322_v36  ;;  %vm349_vm2 = vcmp.lt.s32.totalorder %v1324_v37, 15  ;;  %vm421_vm3 = vcmp.lt.s32.totalorder %v1324_v37, 1  ;;  %vm588_vm4 = vcmp.lt.s32.totalorder %v1324_v37, 127  ;;  %s962_s29 = sshll.u32 %s188_s28, 4 }
  0x18   : > { %s195_s7 = scalar_lea.vmem %s1500_s0, %s978_s30  ;;  %1058 = vset.pattern.permute.xlu1 %v1153_v6  ;;  %v214_v44 = vrot.slane %v209_v41, %v1327_v39  ;;  %v218_v45 = vrot.slane %v209_v41, %v1330_v40  ;;  %v286_v50 = vrot.slane %v965_v46, %v1327_v39  ;;  %v290_v51 = vrot.slane %v965_v46, %v1330_v40  ;;  %s979_s30 = sshll.u32 %s1230_s19, 8 }
  0x19   : > { %v1269_v4 = vld [vmem:[%s195_s7] sm:$0x77]  ;;  %vm660_vm5 = vcmp.lt.s32.totalorder %v1324_v37, 113  ;;  %vm732_vm6 = vcmp.lt.s32.totalorder %v1324_v37, 112  ;;  %vm804_vm7 = vcmp.lt.s32.totalorder %v1324_v37, 111  ;;  %s190_s5 = scalar_lea.vmem [#allocation2], %s962_s29 }
  0x1a   : > { %200 = vrot.lane.b32.xlu0 %v1269_v4, %s1151_s8  ;;  %v1275_v5 = vcombine.high %v1269_v4, %v1269_v4  ;;  %273 = vrot.lane.b32.xlu1 %v1269_v4, %s1152_s9  ;;  %s899_s6 = sshll.u32 %s190_s5, 4  ;;  %s885_s19 = scalar_lea.sflag [#allocation3], %s188_s28  ;;  %s1458_s6 = int_to_ptr.vmem [resolvable:$true] %s899_s6 }
  0x1e   : > { %202 = vrot.lane.b32.xlu0 %v1275_v5, %s1151_s8  ;;  %275 = vrot.lane.b32.xlu1 %v1275_v5, %s1152_s9  ;;  %s1456_s9 = scalar_lea.hbm %s1504_s4, %s979_s30 }
  0x22   : > { %258 = vperm.xlu0 %1056, %v1260_v0   ;;  %314 = vperm.xlu1 %1058, %v1260_v0  }
  0x26   : > { %1057 = vset.pattern.permute.xlu0 %v1154_v7  ;;  %1059 = vset.pattern.permute.xlu1 %v1155_v8 }
  0x27   : > { %298 = vperm.xlu0 %1057, %v1260_v0   ;;  %330 = vperm.xlu1 %1059, %v1260_v0  }
  0x2b   : > { %1060 = vset.pattern.permute.xlu0 %v1156_v9  ;;  %345 = vrot.lane.b32.xlu1 %v1269_v4, %s1157_s10  ;;  %v966_v9 = vld [vmem:[%s1502_s2 + $0x2] ss:$8 sm:$0x3] }
  0x2c   : > { %370 = vperm.xlu0 %1060, %v1260_v0   ;;  %1062 = vset.pattern.permute.xlu1 %v1158_v10 }
  0x2f   : > { %347 = vrot.lane.b32.xlu1 %v1275_v5, %s1157_s10  ;;  %s1084_s10 = scalar_lea.vmem %s1458_s6, 256 }
  0x30   : > { %1061 = vset.pattern.permute.xlu0 %v1159_v11  ;;  %p1085_p11 = scmp.ne.s32.totalorder %s1458_s6, %s1084_s10 }
  0x31   : > { %386 = vperm.xlu0 %1061, %v1260_v0  }
  0x32   : > { %p1086_p12 = pnand %p1085_p11, %p1247_p5 }
  0x33   : > { %402 = vperm.xlu1 %1062, %v1260_v0  }
  0x34   : > { %p1087_p13 = pneg %p1086_p12 }
  0x35   : > { %417 = vrot.lane.b32.xlu0 %v1269_v4, %s1160_s11 }
  0x36   : > { %1064 = vset.pattern.permute.xlu0 %v1161_v12 }
  0x37   : > { %1063 = vset.pattern.permute.xlu1 %v1162_v13 }
  0x38   : > { %442 = vperm.xlu1 %1063, %v1260_v0  }
  0x39   : > { %458 = vperm.xlu0 %1064, %v1260_v0  }
  0x3c   : > { %419 = vrot.lane.b32.xlu1 %v1275_v5, %s1160_s11  ;;  %s1183_s11 = smov [#allocation2]  }
  0x3d   : > { %1067 = vset.pattern.permute.xlu0 %v1163_v14  ;;  %1065 = vset.pattern.permute.xlu1 %v1164_v15 }
  0x3e   : > { %533 = vperm.xlu0 %1067, %v1260_v0  }
  0x40   : > { %474 = vperm.xlu1 %1065, %v1260_v0  }
  0x42   : > { %584 = vrot.lane.b32.xlu0 %v1269_v4, %s1165_s12 }
  0x43   : > { %1070 = vset.pattern.permute.xlu0 %v1166_v16 }
  0x44   : > { %1066 = vset.pattern.permute.xlu1 %v1167_v17 }
  0x45   : > { %506 = vperm.xlu1 %1066, %v1260_v0  }
  0x46   : > { %625 = vperm.xlu0 %1070, %v1260_v0  }
  0x49   : > { %1068 = vset.pattern.permute.xlu1 %v1170_v19  ;;  %v362_v19 = vrot.slane %v966_v9, %v1330_v40 }
  0x4a   : > { %656 = vrot.lane.b32.xlu0 %v1269_v4, %s1168_s13  ;;  %559 = vperm.xlu1 %1068, %v1260_v0  }
  0x4b   : > { %1073 = vset.pattern.permute.xlu0 %v1169_v18  ;;  %v358_v18 = vrot.slane %v966_v9, %v1327_v39 }
  0x4e   : > { %697 = vperm.xlu0 %1073, %v1260_v0   ;;  %1069 = vset.pattern.permute.xlu1 %v1171_v20 }
  0x4f   : > { %609 = vperm.xlu1 %1069, %v1260_v0  }
  0x52   : > { %728 = vrot.lane.b32.xlu0 %v1269_v4, %s1172_s14 }
  0x53   : > { %1076 = vset.pattern.permute.xlu0 %v1173_v21  ;;  %586 = vrot.lane.b32.xlu1 %v1275_v5, %s1165_s12  ;;  %s1088_s12 = sshll.u32 %s1183_s11, 4  ;;  %s1089_s12 = int_to_ptr.vmem [resolvable:$false] %s1088_s12 }
  0x54   : > { %1071 = vset.pattern.permute.xlu1 %v1174_v22  ;;  %p1091_p0 = scmp.lt.s32.totalorder %s1458_s6, %s1089_s12 }
  0x56   : > { %769 = vperm.xlu0 %1076, %v1260_v0  }
  0x57   : > { %641 = vperm.xlu1 %1071, %v1260_v0  }
  0x5a   : > { %800 = vrot.lane.b32.xlu0 %v1269_v4, %s1175_s20 }
  0x5b   : > { %1079 = vset.pattern.permute.xlu0 %v1176_v23  ;;  %1072 = vset.pattern.permute.xlu1 %v1177_v24 }
  0x5c   : > { %681 = vperm.xlu1 %1072, %v1260_v0  }
  0x5e   : > { %841 = vperm.xlu0 %1079, %v1260_v0  }
  0x60   : > { %658 = vrot.lane.b32.xlu1 %v1275_v5, %s1168_s13  ;;  %s1090_s13 = scalar_lea.vmem %s1089_s12, 512 }
  0x61   : > { %1074 = vset.pattern.permute.xlu1 %v1178_v25  ;;  %p1092_p1 = scmp.lt.s32.totalorder %s1090_s13, %s1084_s10 }
  0x62   : > { %1082 = vset.pattern.permute.xlu0 %v1148_v1 }
  0x63   : > { %p1093_p2 = por %p1092_p1, %p1091_p0 }
  0x64   : > { %713 = vperm.xlu1 %1074, %v1260_v0  }
  0x65   : > { %p1094_p3 = pnand %p1093_p2, %p1087_p13 }
  0x68   : > { %1075 = vset.pattern.permute.xlu1 %v1179_v26 }
  0x69   : > { %753 = vperm.xlu1 %1075, %v1260_v0  }
  0x6d   : > { %730 = vrot.lane.b32.xlu1 %v1275_v5, %s1172_s14 }
  0x6e   : > { %1077 = vset.pattern.permute.xlu1 %v1180_v27 }
  0x71   : > { %785 = vperm.xlu1 %1077, %v1260_v0  }
  0x75   : > { %1078 = vset.pattern.permute.xlu1 %v1181_v28 }
  0x76   : > { %825 = vperm.xlu1 %1078, %v1260_v0  }
  0x7a   : > { %802 = vrot.lane.b32.xlu1 %v1275_v5, %s1175_s20 }
  0x7b   : > { %1080 = vset.pattern.permute.xlu1 %v1182_v29 }
  0x7e   : > { %857 = vperm.xlu1 %1080, %v1260_v0  }
  0x82   : > { %1081 = vset.pattern.permute.xlu1 %v1148_v1 }
  0x83   : > { %875 = vperm.xlu1 %1081, %v872_v30  }
  0x8c   : > { %v201_v35 = vpop.permute.xlu0 %200 }
  0x8e   : > { %v227_v31 = vpop.permute.xlu1 %226 }
  0x90   : > { %v203_v42 = vpop.permute.xlu0 %202 }
  0x91   : > { %v207_v47 = vsel %vm206_vm0, %v201_v35, %v203_v42  ;;  %v208_v48 = vsel %vm206_vm0, %v203_v42, %v201_v35 }
  0x92   : > { %v221_v53 = vmul.f32 %v214_v44, %v208_v48  ;;  %v222_v54 = vmul.f32 %v218_v45, %v207_v47  ;;  %v967_v44 = vld [vmem:[%s1502_s2 + $0x3] ss:$8 sm:$0x3] }
  0x93   : > { %v243_v32 = vpop.permute.xlu1 %242 }
  0x94   : > { %v248_v58 = vrot.slane %v221_v53, %v1330_v40  ;;  %v252_v59 = vrot.slane %v222_v54, %v1330_v40  ;;  %v232_v63 = vrot.slane %v221_v53, %v1327_v39  ;;  %v236_v0 = vrot.slane %v222_v54, %v1327_v39 }
  0x95   : > { %v264_v2 = vrot.slane %v221_v53, %v1345_v57  ;;  %v268_v3 = vrot.slane %v222_v54, %v1345_v57  ;;  %v430_v53 = vrot.slane %v967_v44, %v1327_v39  ;;  %v434_v54 = vrot.slane %v967_v44, %v1330_v40 }
  0x96   : > { %v253_v5 = vmul.f32 %v248_v58, %v243_v32  ;;  %v254_v6 = vmul.f32 %v252_v59, %v243_v32  ;;  %v237_v11 = vmul.f32 %v232_v63, %v227_v31  ;;  %v238_v12 = vmul.f32 %v236_v0, %v227_v31 }
  0x97   : > { %v274_v34 = vpop.permute.xlu1 %273 }
  0x98   : > { %v255_v16 = vadd.f32 %v253_v5, %v237_v11  ;;  %v256_v17 = vadd.f32 %v254_v6, %v238_v12 }
  0x9b   : > { %v276_v38 = vpop.permute.xlu1 %275 }
  0x9c   : > { %v278_v55 = vsel %vm277_vm1, %v274_v34, %v276_v38  ;;  %v279_v56 = vsel %vm277_vm1, %v276_v38, %v274_v34 }
  0x9d   : > { %v293_v60 = vmul.f32 %v286_v50, %v279_v56  ;;  %v294_v61 = vmul.f32 %v290_v51, %v278_v55 }
  0x9f   : > { %v304_v7 = vrot.slane %v293_v60, %v1327_v39  ;;  %v308_v8 = vrot.slane %v294_v61, %v1327_v39  ;;  %v320_v27 = vrot.slane %v293_v60, %v1330_v40  ;;  %v324_v28 = vrot.slane %v294_v61, %v1330_v40 }
  0xa0   : > { %v336_v41 = vrot.slane %v293_v60, %v1345_v57  ;;  %v340_v42 = vrot.slane %v294_v61, %v1345_v57  ;;  %v968_v60 = vld [vmem:[%s1502_s2 + $0x4] ss:$8 sm:$0x3] }
  0xa1   : > { %v315_v43 = vpop.permute.xlu1 %314  ;;  %v259_v49 = vpop.permute.xlu0 %258  ;;  %v499_v5 = vrot.slane %v968_v60, %v1330_v40 }
  0xa2   : > { %v269_v14 = vmul.f32 %v264_v2, %v259_v49  ;;  %v270_v15 = vmul.f32 %v268_v3, %v259_v49  ;;  %v325_v35 = vmul.f32 %v320_v27, %v315_v43  ;;  %v326_v38 = vmul.f32 %v324_v28, %v315_v43 }
  0xa3   : > { %v495_v3 = vrot.slane %v968_v60, %v1327_v39 }
  0xa4   : > { %v271_v25 = vadd.f32 %v269_v14, %v255_v16  ;;  %v272_v26 = vadd.f32 %v270_v15, %v256_v17 }
  0xa5   : > { %v500_v14 = vcombine.low %v495_v3, %v499_v5 }
  0xa6   : > { %v331_v52 = vpop.permute.xlu1 %330  ;;  %v299_v1 = vpop.permute.xlu0 %298 }
  0xa7   : > { %v309_v20 = vmul.f32 %v304_v7, %v299_v1  ;;  %v310_v21 = vmul.f32 %v308_v8, %v299_v1  ;;  %v341_v50 = vmul.f32 %v336_v41, %v331_v52  ;;  %v342_v51 = vmul.f32 %v340_v42, %v331_v52 }
  0xa9   : > { %v311_v32 = vadd.f32 %v309_v20, %v271_v25  ;;  %v312_v33 = vadd.f32 %v310_v21, %v272_v26  ;;  %v516_v25 = vsub.s32 4, %v1322_v36 }
  0xaa   : > { %v346_v62 = vpop.permute.xlu1 %345 }
  0xab   : > { %v371_v13 = vpop.permute.xlu0 %370  ;;  %v327_v48 = vadd.f32 %v325_v35, %v311_v32  ;;  %v328_v49 = vadd.f32 %v326_v38, %v312_v33  ;;  %v568_v38 = vsub.s32 6, %v1322_v36 }
  0xad   : > { %v343_v61 = vadd.f32 %v341_v50, %v327_v48  ;;  %v969_v50 = vld [vmem:[%s1502_s2 + $0x5] ss:$8 sm:$0x3] }
  0xae   : > { %v348_v10 = vpop.permute.xlu1 %347 }
  0xaf   : > { %v350_v22 = vsel %vm349_vm2, %v346_v62, %v348_v10  ;;  %v351_v23 = vsel %vm349_vm2, %v348_v10, %v346_v62  ;;  %v344_v62 = vadd.f32 %v342_v51, %v328_v49 }
  0xb0   : > { %v365_v29 = vmul.f32 %v358_v18, %v351_v23  ;;  %v366_v30 = vmul.f32 %v362_v19, %v350_v22  ;;  %v387_v31 = vpop.permute.xlu0 %386  ;;  %v502_v23 = vmul.f32 %v500_v14, %v1269_v4 }
  0xb2   : > { %v403_v24 = vpop.permute.xlu1 %402  ;;  %v376_v45 = vrot.slane %v365_v29, %v1327_v39  ;;  %v380_v46 = vrot.slane %v366_v30, %v1327_v39  ;;  %v392_v63 = vrot.slane %v365_v29, %v1330_v40  ;;  %v396_v0 = vrot.slane %v366_v30, %v1330_v40 }
  0xb3   : > { %v408_v8 = vrot.slane %v365_v29, %v1345_v57  ;;  %v412_v9 = vrot.slane %v366_v30, %v1345_v57  ;;  %v517_v35 = vrot.slane %v502_v23, %v516_v25 }
  0xb4   : > { %v418_v47 = vpop.permute.xlu0 %417  ;;  %v381_v58 = vmul.f32 %v376_v45, %v371_v13  ;;  %v382_v59 = vmul.f32 %v380_v46, %v371_v13  ;;  %v397_v10 = vmul.f32 %v392_v63, %v387_v31  ;;  %v398_v11 = vmul.f32 %v396_v0, %v387_v31 }
  0xb5   : > { %v413_v18 = vmul.f32 %v408_v8, %v403_v24  ;;  %v414_v19 = vmul.f32 %v412_v9, %v403_v24  ;;  %v542_v31 = vsub.s32 5, %v1322_v36  ;;  %v513_v24 = vrot.slane %v502_v23, %v1327_v39 }
  0xb6   : > { %v383_v6 = vadd.f32 %v381_v58, %v343_v61  ;;  %v384_v7 = vadd.f32 %v382_v59, %v344_v62  ;;  %v539_v45 = vrot.slane %v502_v23, %v1330_v40  ;;  %v527_v36 = vrot.slane %v517_v35, %v1327_v39 }
  0xb7   : > { %v443_v34 = vpop.permute.xlu1 %442  ;;  %v543_v46 = vrot.slane %v502_v23, %v542_v31  ;;  %v523_v51 = vrot.slane %v513_v24, %v1327_v39  ;;  %v597_v61 = vrot.slane %v969_v50, %v1327_v39  ;;  %v601_v62 = vrot.slane %v969_v50, %v1330_v40 }
  0xb8   : > { %v399_v16 = vadd.f32 %v397_v10, %v383_v6  ;;  %v400_v17 = vadd.f32 %v398_v11, %v384_v7  ;;  %v459_v22 = vpop.permute.xlu0 %458  ;;  %v549_v58 = vrot.slane %v539_v45, %v1330_v40 }
  0xb9   : > { %v553_v59 = vrot.slane %v543_v46, %v1330_v40 }
  0xba   : > { %v415_v26 = vadd.f32 %v413_v18, %v399_v16  ;;  %v416_v27 = vadd.f32 %v414_v19, %v400_v17 }
  0xbb   : > { %v420_v43 = vpop.permute.xlu1 %419 }
  0xbc   : > { %v422_v55 = vsel %vm421_vm3, %v418_v47, %v420_v43  ;;  %v423_v56 = vsel %vm421_vm3, %v420_v43, %v418_v47 }
  0xbd   : > { %v437_v52 = vmul.f32 %v430_v53, %v423_v56  ;;  %v438_v1 = vmul.f32 %v434_v54, %v422_v55  ;;  %v565_v55 = vrot.slane %v502_v23, %v1345_v57  ;;  %v569_v56 = vrot.slane %v502_v23, %v568_v38 }
  0xbf   : > { %v475_v2 = vpop.permute.xlu1 %474  ;;  %v448_v12 = vrot.slane %v437_v52, %v1327_v39  ;;  %v452_v13 = vrot.slane %v438_v1, %v1327_v39  ;;  %v464_v28 = vrot.slane %v437_v52, %v1330_v40  ;;  %v468_v29 = vrot.slane %v438_v1, %v1330_v40 }
  0xc0   : > { %v480_v4 = vrot.slane %v437_v52, %v1345_v57  ;;  %v484_v41 = vrot.slane %v438_v1, %v1345_v57  ;;  %v579_v6 = vrot.slane %v569_v56, %v1345_v57 }
  0xc1   : > { %v453_v20 = vmul.f32 %v448_v12, %v443_v34  ;;  %v454_v21 = vmul.f32 %v452_v13, %v443_v34  ;;  %v534_v34 = vpop.permute.xlu0 %533  ;;  %v469_v42 = vmul.f32 %v464_v28, %v459_v22  ;;  %v470_v44 = vmul.f32 %v468_v29, %v459_v22 }
  0xc2   : > { %v485_v53 = vmul.f32 %v480_v4, %v475_v2  ;;  %v486_v54 = vmul.f32 %v484_v41, %v475_v2  ;;  %v575_v2 = vrot.slane %v565_v55, %v1345_v57  ;;  %v554_v12 = vmul.f32 %v549_v58, %v534_v34 }
  0xc3   : > { %v455_v32 = vadd.f32 %v453_v20, %v415_v26  ;;  %v456_v33 = vadd.f32 %v454_v21, %v416_v27  ;;  %v555_v13 = vmul.f32 %v553_v59, %v534_v34 }
  0xc4   : > { %v507_v15 = vpop.permute.xlu1 %506 }
  0xc5   : > { %v471_v48 = vadd.f32 %v469_v42, %v455_v32  ;;  %v472_v49 = vadd.f32 %v470_v44, %v456_v33  ;;  %v585_v43 = vpop.permute.xlu0 %584  ;;  %v528_v3 = vmul.f32 %v523_v51, %v507_v15  ;;  %v529_v5 = vmul.f32 %v527_v36, %v507_v15  ;;  %v970_v15 = vld [vmem:[%s1502_s2 + $0x6] ss:$8 sm:$0x3] }
  0xc6   : > { %v669_v23 = vrot.slane %v970_v15, %v1327_v39  ;;  %v673_v25 = vrot.slane %v970_v15, %v1330_v40 }
  0xc7   : > { %v487_v63 = vadd.f32 %v485_v53, %v471_v48  ;;  %v488_v0 = vadd.f32 %v486_v54, %v472_v49 }
  0xc9   : > { %v560_v30 = vpop.permute.xlu1 %559  ;;  %v530_v10 = vadd.f32 %v528_v3, %v487_v63  ;;  %v531_v11 = vadd.f32 %v529_v5, %v488_v0  ;;  %v626_v14 = vpop.permute.xlu0 %625 }
  0xca   : > { %v580_v20 = vmul.f32 %v575_v2, %v560_v30  ;;  %v581_v21 = vmul.f32 %v579_v6, %v560_v30 }
  0xcb   : > { %v556_v18 = vadd.f32 %v554_v12, %v530_v10  ;;  %v557_v19 = vadd.f32 %v555_v13, %v531_v11 }
  0xcd   : > { %v582_v28 = vadd.f32 %v580_v20, %v556_v18  ;;  %v583_v29 = vadd.f32 %v581_v21, %v557_v19  ;;  %v657_v31 = vpop.permute.xlu0 %656 }
  0xce   : > { %v610_v47 = vpop.permute.xlu1 %609 }
  0xd1   : > { %v698_v36 = vpop.permute.xlu0 %697 }
  0xd2   : > { %v587_v60 = vpop.permute.xlu1 %586 }
  0xd3   : > { %v589_v52 = vsel %vm588_vm4, %v585_v43, %v587_v60  ;;  %v590_v1 = vsel %vm588_vm4, %v587_v60, %v585_v43  ;;  %v971_v43 = vld [vmem:[%s1502_s2 + $0x7] ss:$8 sm:$0x3] }
  0xd4   : > { %v604_v7 = vmul.f32 %v597_v61, %v589_v52  ;;  %v605_v8 = vmul.f32 %v601_v62, %v590_v1  ;;  %v741_v59 = vrot.slane %v971_v43, %v1327_v39  ;;  %v745_v60 = vrot.slane %v971_v43, %v1330_v40 }
  0xd5   : > { %v729_v3 = vpop.permute.xlu0 %728 }
  0xd6   : > { %v642_v9 = vpop.permute.xlu1 %641  ;;  %v615_v16 = vrot.slane %v604_v7, %v1327_v39  ;;  %v619_v17 = vrot.slane %v605_v8, %v1327_v39  ;;  %v631_v33 = vrot.slane %v604_v7, %v1330_v40  ;;  %v635_v24 = vrot.slane %v605_v8, %v1330_v40 }
  0xd7   : > { %v647_v42 = vrot.slane %v604_v7, %v1345_v57  ;;  %v651_v44 = vrot.slane %v605_v8, %v1345_v57 }
  0xd8   : > { %v620_v26 = vmul.f32 %v615_v16, %v610_v47  ;;  %v621_v27 = vmul.f32 %v619_v17, %v610_v47  ;;  %v636_v46 = vmul.f32 %v631_v33, %v626_v14  ;;  %v637_v47 = vmul.f32 %v635_v24, %v626_v14 }
  0xd9   : > { %v652_v53 = vmul.f32 %v647_v42, %v642_v9  ;;  %v653_v54 = vmul.f32 %v651_v44, %v642_v9 }
  0xda   : > { %v622_v4 = vadd.f32 %v620_v26, %v582_v28  ;;  %v623_v41 = vadd.f32 %v621_v27, %v583_v29  ;;  %v972_v28 = vld [vmem:[%s1502_s2 + $0x10] ss:$8 sm:$0x3] }
  0xdb   : > { %v682_v22 = vpop.permute.xlu1 %681  ;;  %v813_v33 = vrot.slane %v972_v28, %v1327_v39  ;;  %v817_v24 = vrot.slane %v972_v28, %v1330_v40 }
  0xdc   : > { %v638_v50 = vadd.f32 %v636_v46, %v622_v4  ;;  %v639_v51 = vadd.f32 %v637_v47, %v623_v41 }
  0xde   : > { %v654_v61 = vadd.f32 %v652_v53, %v638_v50  ;;  %v655_v62 = vadd.f32 %v653_v54, %v639_v51 }
  0xdf   : > { %v659_v32 = vpop.permute.xlu1 %658 }
  0xe0   : > { %v661_v35 = vsel %vm660_vm5, %v657_v31, %v659_v32  ;;  %v662_v34 = vsel %vm660_vm5, %v659_v32, %v657_v31 }
  0xe1   : > { %v676_v30 = vmul.f32 %v669_v23, %v661_v35  ;;  %v677_v38 = vmul.f32 %v673_v25, %v662_v34 }
  0xe3   : > { %v714_v45 = vpop.permute.xlu1 %713  ;;  %v687_v48 = vrot.slane %v676_v30, %v1327_v39  ;;  %v691_v49 = vrot.slane %v677_v38, %v1327_v39  ;;  %v703_v63 = vrot.slane %v676_v30, %v1330_v40  ;;  %v707_v0 = vrot.slane %v677_v38, %v1330_v40 }
  0xe4   : > { %v719_v2 = vrot.slane %v676_v30, %v1345_v57  ;;  %v723_v6 = vrot.slane %v677_v38, %v1345_v57 }
  0xe5   : > { %v692_v55 = vmul.f32 %v687_v48, %v682_v22  ;;  %v693_v56 = vmul.f32 %v691_v49, %v682_v22  ;;  %v708_v9 = vmul.f32 %v703_v63, %v698_v36  ;;  %v709_v10 = vmul.f32 %v707_v0, %v698_v36  ;;  %v770_v22 = vpop.permute.xlu0 %769 }
  0xe6   : > { %v724_v18 = vmul.f32 %v719_v2, %v714_v45  ;;  %v725_v19 = vmul.f32 %v723_v6, %v714_v45 }
  0xe7   : > { %v694_v52 = vadd.f32 %v692_v55, %v654_v61  ;;  %v695_v1 = vadd.f32 %v693_v56, %v655_v62 }
  0xe8   : > { %v754_v58 = vpop.permute.xlu1 %753 }
  0xe9   : > { %v710_v13 = vadd.f32 %v708_v9, %v694_v52  ;;  %v711_v14 = vadd.f32 %v709_v10, %v695_v1  ;;  %v801_v4 = vpop.permute.xlu0 %800 }
  0xeb   : > { %v726_v23 = vadd.f32 %v724_v18, %v710_v13  ;;  %v727_v25 = vadd.f32 %v725_v19, %v711_v14 }
  0xec   : > { %v731_v5 = vpop.permute.xlu1 %730 }
  0xed   : > { %v733_v7 = vsel %vm732_vm6, %v729_v3, %v731_v5  ;;  %v734_v8 = vsel %vm732_vm6, %v731_v5, %v729_v3  ;;  %v842_v55 = vpop.permute.xlu0 %841 }
  0xee   : > { %v748_v11 = vmul.f32 %v741_v59, %v733_v7  ;;  %v749_v12 = vmul.f32 %v745_v60, %v734_v8 }
  0xf0   : > { %v759_v16 = vrot.slane %v748_v11, %v1327_v39  ;;  %v763_v17 = vrot.slane %v749_v12, %v1327_v39  ;;  %v786_v15 = vpop.permute.xlu1 %785  ;;  %v775_v26 = vrot.slane %v748_v11, %v1330_v40  ;;  %v779_v27 = vrot.slane %v749_v12, %v1330_v40 }
  0xf1   : > { %v791_v30 = vrot.slane %v748_v11, %v1345_v57  ;;  %v795_v38 = vrot.slane %v749_v12, %v1345_v57 }
  0xf2   : > { %v764_v20 = vmul.f32 %v759_v16, %v754_v58  ;;  %v765_v21 = vmul.f32 %v763_v17, %v754_v58  ;;  %v780_v35 = vmul.f32 %v775_v26, %v770_v22  ;;  %v781_v34 = vmul.f32 %v779_v27, %v770_v22 }
  0xf3   : > { %v796_v37 = vmul.f32 %v791_v30, %v786_v15  ;;  %v797_v49 = vmul.f32 %v795_v38, %v786_v15 }
  0xf4   : > { %v766_v31 = vadd.f32 %v764_v20, %v726_v23  ;;  %v767_v32 = vadd.f32 %v765_v21, %v727_v25 }
  0xf5   : > { %v826_v29 = vpop.permute.xlu1 %825 }
  0xf6   : > { %v782_v42 = vadd.f32 %v780_v35, %v766_v31  ;;  %v783_v44 = vadd.f32 %v781_v34, %v767_v32 }
  0xf8   : > { %v798_v36 = vadd.f32 %v796_v37, %v782_v42  ;;  %v799_v43 = vadd.f32 %v797_v49, %v783_v44 }
  0xf9   : > { %v803_v41 = vpop.permute.xlu1 %802 }
  0xfa   : > { %v805_v45 = vsel %vm804_vm7, %v801_v4, %v803_v41  ;;  %v806_v46 = vsel %vm804_vm7, %v803_v41, %v801_v4 }
  0xfb   : > { %v820_v47 = vmul.f32 %v813_v33, %v805_v45  ;;  %v821_v48 = vmul.f32 %v817_v24, %v806_v46 }
  0xfd   : > { %v831_v50 = vrot.slane %v820_v47, %v1327_v39  ;;  %v835_v51 = vrot.slane %v821_v48, %v1327_v39  ;;  %v847_v53 = vrot.slane %v820_v47, %v1330_v40  ;;  %v851_v54 = vrot.slane %v821_v48, %v1330_v40  ;;  %v858_v61 = vpop.permute.xlu1 %857 }
  0xfe   : > { %v863_v56 = vrot.slane %v820_v47, %v1345_v57  ;;  %v867_v58 = vrot.slane %v821_v48, %v1345_v57 }
  0xff   : > { %v836_v59 = vmul.f32 %v831_v50, %v826_v29  ;;  %v837_v60 = vmul.f32 %v835_v51, %v826_v29  ;;  %v852_v63 = vmul.f32 %v847_v53, %v842_v55  ;;  %v853_v0 = vmul.f32 %v851_v54, %v842_v55 }
 0x100   : > { %v868_v52 = vmul.f32 %v863_v56, %v858_v61  ;;  %v869_v1 = vmul.f32 %v867_v58, %v858_v61 }
 0x101   : > { %v838_v62 = vadd.f32 %v836_v59, %v798_v36  ;;  %v839_v39 = vadd.f32 %v837_v60, %v799_v43 }
 0x102   : > { %v876_v5 = vpop.permute.xlu1 %875 }
 0x103   : > { %v854_v3 = vadd.f32 %v852_v63, %v838_v62  ;;  %v855_v40 = vadd.f32 %v853_v0, %v839_v39 }
 0x105   : > { %v870_v2 = vadd.f32 %v868_v52, %v854_v3  ;;  %v871_v6 = vadd.f32 %v869_v1, %v855_v40 }
 0x107   : > { %v878_v57 = vadd.f32 %v876_v5, %v870_v2  ;;  %v879_v7 = vadd.f32 %v876_v5, %v871_v6 }
 0x109   : > { %v880_v8 = vmax.f32 %v878_v57, 0.0  ;;  %v881_v9 = vmax.f32 %v879_v7, 0.0 }
 0x10b   : > { %882 = vst [vmem:[%s190_s5] sm:$0xff] %v880_v8  ;;  %883 = vst [vmem:[%s190_s5 + $0x8] sm:$0xff] %v881_v9 }
 0x10c   : > { %1097 = shalt.err (!%p1094_p3)
}
 0x10d   : > { %s1098_s14 = scalar_lea.hbm %s1456_s9, 256  ;;  %s1102_s23 = scalar_lea.hbm %s1504_s4, 512 }
 0x10e   : > { %p1099_p4 = scmp.ne.s32.totalorder %s1456_s9, %s1098_s14  ;;  %p1103_p9 = scmp.lt.u32.totalorder %s1456_s9, %s1504_s4 }
 0x10f   : > { %p1104_p10 = scmp.lt.u32.totalorder %s1102_s23, %s1098_s14  ;;  %p1106_p12 = scmp.lt.u32.totalorder %s1098_s14, %s1456_s9 }
 0x110   : > { %p1100_p7 = pnand %p1099_p4, %p1247_p5 }
 0x111   : > { %p1105_p11 = por %p1104_p10, %p1103_p9 }
 0x112   : > { %p1101_p8 = pneg %p1100_p7 }
 0x113   : > { %p1107_p13 = por %p1106_p12, %p1105_p11 }
 0x115   : > { %p1108_p0 = pnand %p1107_p13, %p1101_p8 }
 0x117   : > { %1111 = shalt.err (!%p1108_p0)
}
 0x118   : > { %980 = dma.vmem_to_hbm [thread:$0]  (%p1247_p5), %s1458_s6, 256, %s1456_s9, %s885_s19  }
 0x119 PF: > { %p986_p1 = scmp.ge.s32.totalorder %s1146_s18, 2  ;;  %s911_s29 = sand.u32 1, %s1134_s15  }
 0x11a   : > { %s912_s30 = scalar_lea.sflag [#allocation3], %s911_s29 }
 0x11b   : > { %p983_p2 = pnand %p986_p1, %p1251_p6 }
 0x11d   : > { %1129 = dma.done.wait (!%p983_p2), %s912_s30, 256  }
 0x11e   : > { %1131 = vsyncadd (!%p983_p2), %s912_s30, 4294967040  ;;  %p14_p3 = scmp.ge.s32.totalorder %s1234_s21, 4   ;;  %s1507_s15 = smov %s1138_s16 }
 0x11f   : > { %s1508_s16 = smov %s1142_s17  ;;  %s1509_s17 = smov %s1245_s24 }
 0x120   : > { %s1510_s18 = smov %s1234_s21  ;;  %16 = sbr.rel (!%p14_p3) target bundleno = 3 (0x3), region = 79 }
 0x127   :  { %917 = vsyncpa [#allocation3], 1 }
 0x128   :  { %919 = vsyncpa [#allocation3 + $0x1], 1 }

</bundles_post_ra>
